<compile_context>
chip_gen: v6e
topology: v6e:2x2x1
jax: 0.10.0
libtpu: 0.0.40
codegen_flags: <defaults>
</compile_context>

<pallas_src>
import functools
import math

import jax
import jax.numpy as jnp
from jax.experimental import pallas as pl
from jax.experimental.pallas import tpu as pltpu


def _abs_diff(x, label):
    x = x.astype(jnp.float32)
    if label == 0.0:
        return jnp.abs(x)
    return jnp.abs(x - jnp.float32(label))


def _l1_mean_single_kernel(x_ref, out_ref, *, label, total):
    """Single grid step: whole slab resident, reduce directly (no scratch)."""
    diff = _abs_diff(x_ref[...], label)
    out_ref[0, 0] = jnp.sum(diff) / jnp.float32(total)


def _l1_mean_multi_kernel(x_ref, out_ref, acc_ref, *,
                          label, rows, block_rows, lanes, total, needs_mask):
    """Fold |x - label| tiles into an (8, lanes) vreg-sized accumulator.

    x_ref   : VMEM (block_rows, lanes)  -- one lane-dense tile of the input
    out_ref : SMEM (1, 1) f32           -- scalar output (the mean L1 loss)
    acc_ref : VMEM (8, lanes) f32       -- single-vreg-per-128-lanes accumulator
    """
    i = pl.program_id(0)
    last = pl.num_programs(0) - 1

    @pl.when(i == 0)
    def _():
        acc_ref[...] = jnp.zeros_like(acc_ref)

    diff = _abs_diff(x_ref[...], label)

    def _fold(d):
        # Groups of 8 rows map exactly onto (8, 128) vreg tiles, so this is
        # pure VPU vreg+vreg adds; no block-sized accumulator traffic.
        acc_ref[...] += d.reshape(block_rows // 8, 8, lanes).sum(axis=0)

    if needs_mask:
        # Only the last grid step can be ragged; everyone else folds unmasked.
        @pl.when(i != last)
        def _():
            _fold(diff)

        @pl.when(i == last)
        def _():
            row_ids = jax.lax.broadcasted_iota(jnp.int32, (block_rows, lanes), 0)
            valid = rows - i * block_rows  # remaining valid rows in this tile
            _fold(jnp.where(row_ids < valid, diff, 0.0))
    else:
        _fold(diff)

    @pl.when(i == last)
    def _():
        out_ref[0, 0] = jnp.sum(acc_ref[...]) / jnp.float32(total)


def _tile_budget():
    """(target tile bytes, vmem_limit_bytes) heuristics per TPU generation."""
    try:
        vmem = pltpu.get_tpu_info().vmem_capacity_bytes
        if vmem <= (80 << 20):
            # v7x-class: 64 MiB VMEM, ~3.2 TB/s HBM -> large tiles to amortize
            # the ~0.35 us fixed per-grid-step cost.
            return 8 << 20, 48 << 20
    except Exception:
        pass
    # v5e / v6e: 128 MiB VMEM, slower HBM already hides per-step overhead.
    return 4 << 20, 32 << 20


def gan_loss(d_last_layer, is_d_input_real, *, max_block_rows=None):
    """L1-mean loss of `d_last_layer` against an all-ones / all-zeros label.

    d_last_layer: array of shape [N, C, H, W] (PyTorch NCHW convention).
    is_d_input_real: static Python bool selecting the real (1.0) / fake (0.0)
      label (must not be a traced value).
    Returns a scalar float32.
    """
    label = 1.0 if is_d_input_real else 0.0
    shape = d_last_layer.shape
    total = int(math.prod(shape))
    itemsize = jnp.dtype(d_last_layer.dtype).itemsize
    tile_bytes, vmem_limit = _tile_budget()

    W = shape[-1] if len(shape) >= 1 else 1
    tail = None
    if len(shape) >= 2 and W % 128 == 0 and 8 * W * itemsize <= tile_bytes:
        # Minor dim already lane-aligned: collapse leading dims only
        # (metadata-only reshape, no relayout copy).
        lanes = W
        x2d = d_last_layer.reshape(total // W, W)
    else:
        lanes = 128
        flat = d_last_layer.reshape(-1)
        body = (total // 128) * 128
        if body == 0:
            # Fewer than 128 elements total: a kernel launch is pure overhead.
            return jnp.mean(jnp.abs(flat.astype(jnp.float32) - jnp.float32(label)))
        if body < total:
            # <128-element tail: handled wrapper-side, no full-array concat.
            tail = flat[body:]
        x2d = flat[:body].reshape(body // 128, 128)

    rows = x2d.shape[0]

    if max_block_rows is None:
        max_block_rows = max(8, (tile_bytes // (lanes * itemsize)) // 8 * 8)
    else:
        max_block_rows = max(8, (int(max_block_rows) // 8) * 8)

    cost = pl.CostEstimate(
        flops=2 * total, transcendentals=0,
        bytes_accessed=total * itemsize + 4)

    if rows <= max_block_rows:
        # Single grid step: full-extent block is always layout-legal; skip the
        # accumulator and its zero-init / read-modify-write entirely.
        kernel = functools.partial(_l1_mean_single_kernel, label=label, total=total)
        grid = (1,)
        in_specs = [pl.BlockSpec((rows, lanes), lambda i: (0, 0))]
        scratch = []
    else:
        block_rows = max_block_rows  # multiple of 8
        grid = (pl.cdiv(rows, block_rows),)
        needs_mask = (rows % block_rows) != 0
        kernel = functools.partial(
            _l1_mean_multi_kernel, label=label, rows=rows,
            block_rows=block_rows, lanes=lanes, total=total,
            needs_mask=needs_mask)
        in_specs = [pl.BlockSpec((block_rows, lanes), lambda i: (i, 0))]
        scratch = [pltpu.VMEM((8, lanes), jnp.float32)]

    out = pl.pallas_call(
        kernel,
        out_shape=jax.ShapeDtypeStruct((1, 1), jnp.float32),
        grid_spec=pltpu.PrefetchScalarGridSpec(
            num_scalar_prefetch=0,
            grid=grid,
            in_specs=in_specs,
            out_specs=pl.BlockSpec(memory_space=pltpu.MemorySpace.SMEM),
            scratch_shapes=scratch,
        ),
        compiler_params=pltpu.CompilerParams(
            dimension_semantics=("arbitrary",),
            vmem_limit_bytes=vmem_limit,
        ),
        cost_estimate=cost,
    )(x2d)

    loss = out[0, 0]
    if tail is not None:
        tail_sum = jnp.sum(jnp.abs(tail.astype(jnp.float32) - jnp.float32(label)))
        loss = loss + tail_sum / jnp.float32(total)
    return loss


if __name__ == "__main__":
    key = jax.random.PRNGKey(0)

    def ref_loss(x, real):
        lab = 1.0 if real else 0.0
        return jnp.mean(jnp.abs(x.astype(jnp.float32) - lab))

    # GANLoss(d_last_layer_size=16): discriminator map shaped [1, 1, 16, 16].
    d_last_layer_size = 16
    k1, k2, k3, k4 = jax.random.split(key, 4)
    d_last_layer = jax.random.normal(
        k1, (1, 1, d_last_layer_size, d_last_layer_size), dtype=jnp.float32)

    loss_real = gan_loss(d_last_layer, True)
    loss_fake = gan_loss(d_last_layer, False)
    jax.block_until_ready((loss_real, loss_fake))
    assert jnp.allclose(loss_real, ref_loss(d_last_layer, True),
                        atol=1e-5, rtol=1e-5), (loss_real, ref_loss(d_last_layer, True))
    assert jnp.allclose(loss_fake, ref_loss(d_last_layer, False),
                        atol=1e-5, rtol=1e-5), (loss_fake, ref_loss(d_last_layer, False))

    # Multi-step grid with ragged last block (forced small tiles):
    # 48*48 -> 18 lane-dense rows, block_rows=8 -> 3 steps, last step masked.
    x2 = jax.random.normal(k2, (1, 1, 48, 48), dtype=jnp.float32)
    got2 = gan_loss(x2, True, max_block_rows=8)
    assert jnp.allclose(got2, ref_loss(x2, True), atol=1e-5, rtol=1e-5), (got2, ref_loss(x2, True))

    # total % 128 != 0: lane-aligned body in the kernel, <128-element tail
    # summed wrapper-side (no full-array concatenate / copy).
    x3 = jax.random.normal(k3, (1, 1, 12, 12), dtype=jnp.float32)
    got3 = gan_loss(x3, False)
    assert jnp.allclose(got3, ref_loss(x3, False), atol=1e-5, rtol=1e-5), (got3, ref_loss(x3, False))

    # Lane-aligned minor dim (W % 128 == 0): leading-dim-only collapse path.
    x4 = jax.random.normal(k4, (1, 1, 8, 256), dtype=jnp.float32)
    got4 = gan_loss(x4, True)
    assert jnp.allclose(got4, ref_loss(x4, True), atol=1e-5, rtol=1e-5), (got4, ref_loss(x4, True))

    jax.block_until_ready((got2, got3, got4))
    print("KERNEL_OK")
</pallas_src>

<mosaic_0001>
module attributes {stable_mosaic.version = 11 : i64} {
  func.func @_l1_mean_single_kernel(%arg0: i32, %arg1: memref<2x128xf32, #tpu.memory_space<vmem>>, %arg2: memref<1x1xf32, #tpu.memory_space<smem>>) attributes {dimension_semantics = [#tpu.dimension_semantics<arbitrary>], iteration_bounds = array<i64: 1>, scalar_prefetch = 0 : i64, scratch_operands = 0 : i64, tpu.core_type = #tpu.core_type<tc>, window_params = [{pipeline_mode = #tpu.pipeline_mode<synchronous>, transform_indices = @transform_0, window_bounds = array<i64: 2, 128>}, {transform_indices = @transform_1, window_bounds = array<i64: 1, 1>}]} {
    %c0 = arith.constant 0 : index
    %c0_0 = arith.constant 0 : index
    %0 = vector.load %arg1[%c0, %c0_0] : memref<2x128xf32, #tpu.memory_space<vmem>>, vector<2x128xf32>
    %cst = arith.constant 1.000000e+00 : f32
    %1 = vector.broadcast %cst : f32 to vector<2x128xf32>
    %2 = arith.subf %0, %1 : vector<2x128xf32>
    %3 = math.absf %2 : vector<2x128xf32>
    %4 = vector.shape_cast %3 : vector<2x128xf32> to vector<1x2x128xf32>
    %cst_1 = arith.constant dense<0.000000e+00> : vector<1xf32>
    %5 = vector.multi_reduction <add>, %4, %cst_1 [1, 2] : vector<1x2x128xf32> to vector<1xf32>
    %6 = vector.shape_cast %5 : vector<1xf32> to vector<1x1x1xf32>
    %7 = vector.extract %6[0, 0, 0] : f32 from vector<1x1x1xf32>
    %cst_2 = arith.constant 2.560000e+02 : f32
    %8 = arith.divf %7, %cst_2 : f32
    %c0_3 = arith.constant 0 : index
    %c0_4 = arith.constant 0 : index
    %9 = memref.load %arg2[%c0_3, %c0_4] : memref<1x1xf32, #tpu.memory_space<smem>>
    memref.store %8, %arg2[%c0_3, %c0_4] : memref<1x1xf32, #tpu.memory_space<smem>>
    return
  }
  func.func @transform_0(%arg0: i32) -> (i32, i32) {
    %c0_i32 = arith.constant 0 : i32
    %c0_i32_0 = arith.constant 0 : i32
    %c0_i32_1 = arith.constant 0 : i32
    return %c0_i32, %c0_i32_0 : i32, i32
  }
  func.func @transform_1(%arg0: i32) -> (i32, i32) {
    %c0_i32 = arith.constant 0 : i32
    %c0_i32_0 = arith.constant 0 : i32
    %c0_i32_1 = arith.constant 0 : i32
    return %c0_i32, %c0_i32_0 : i32, i32
  }
}

</mosaic_0001>

<bundles_post_ra>
// kernel: tpu_custom_call.1
= control target key start
LH: loop header
LB: loop body
LE: loop exit
PB: predicated region body
PF: predicated region fallthrough
CT: control target
= control target key end

     0   :  { %6 = vsyncpa [#allocation3], 0  ;;  %s109_s0 = inlined_call_operand.hbm [shape: f32[2,128], index: 0, kind: input, shape index: {}]   ;;  %s110_s1 = inlined_call_operand.hbm [shape: f32[1,1], index: 1, kind: output, shape index: {}]  }
   0x1   :  { %7 = vsyncpa [#allocation4], 0  ;;  %s91_s6 = smov [#allocation2]  }
   0x2   :  { %s14_s7 = sshll.u32 %s91_s6, 4  ;;  %s15_s7 = int_to_ptr.vmem [resolvable:$true] %s14_s7 }
   0x3   :  { %s67_s8 = scalar_lea.vmem %s15_s7, 32  ;;  %p72_p1 = scmp.lt.s32.totalorder %s15_s7, %s15_s7 }
   0x4   :  { %p68_p0 = scmp.ne.s32.totalorder %s15_s7, %s67_s8  ;;  %p73_p2 = scmp.lt.s32.totalorder %s67_s8, %s67_s8 }
   0x6   :  { %p74_p3 = por %p73_p2, %p72_p1 }
   0x8   :  { %p75_p4 = pnand %p74_p3, %p68_p0 }
   0xa   :  { %78 = shalt.err (!%p75_p4)
}
   0xb   :  { %17 = dma.hbm_to_vmem [thread:$0]  %s109_s0, 32, %s15_s7, [#allocation3]  }
   0xc   :  { %87 = dma.done.wait [#allocation3], 32  }
   0xd   :  { %88 = vsyncadd [#allocation3], 4294967264  ;;  %v21_v0 = vld [vmem:[#allocation2] sm:$0x3]  ;;  %vm24_vm0 = vcmask 1041408   ;;  %s92_s0 = smov [#allocation5]  }
   0xe   :  { %v54_v1 = vadd.f32 -1.0, %v21_v0 }
  0x10   :  { %v23_v2 = vand.u32 2147483647, %v54_v1 }
  0x12   :  { %v25_v3 = vsel %vm24_vm0, %v23_v2, 0.0 }
  0x13   :  { %26 = vadd.xlane.f32.xlu0 %v25_v3 }
  0x9c   :  { %v27_v4 = vpop.xlane.xlu0 %26 }
  0x9d   :  { %v28_v5 = vrot.slane %v27_v4, 4 }
  0x9f   :  { %v29_v6 = vadd.f32 %v28_v5, %v27_v4 }
  0xa1   :  { %v30_v7 = vrot.slane %v29_v6, 2 }
  0xa3   :  { %v31_v8 = vadd.f32 %v30_v7, %v29_v6 }
  0xa5   :  { %v32_v9 = vrot.slane %v31_v8, 1 }
  0xa7   :  { %v33_v10 = vadd.f32 %v32_v9, %v31_v8 }
  0xa9   :  { %55 = vpush %v33_v10 }
  0xda   :  { %s56_s11 = spop %55 }
  0xdb   :  { %s37_s12 = smul.f32 0.00390625, %s56_s11 }
  0xdd   :  { %39 = sst [smem:[#allocation5]] %s37_s12 }
  0xde   :  { %47 = dma.smem_to_hbm %s92_s0, 16, %s110_s1, [#allocation4]  }
  0xdf   :  { %89 = dma.done.wait [#allocation4], 16  }
  0xe0   :  { %90 = vsyncadd [#allocation4], 4294967280 }
  0xe1   :  { %51 = sfence }
  0xe2   :  { %52 = vsyncpa [#allocation3], 1 }
  0xe3   :  { %53 = vsyncpa [#allocation4], 1 }

</bundles_post_ra>
